<compile_context>
chip_gen: v7x
topology: tpu7x:2x2x1
jax: 0.10.0
libtpu: 0.0.40
codegen_flags: <defaults>
</compile_context>

<pallas_src>
import functools

import jax
import jax.numpy as jnp
from jax.experimental import pallas as pl
from jax.experimental.pallas import tpu as pltpu


# -----------------------------------------------------------------------------
# Kernel 1: temporal conv (K,1) as one im2col matmul per batch element,
# channels-first, with fused BatchNorm statistics.
# -----------------------------------------------------------------------------
def _tcn_conv_stats_kernel(x_ref, w_ref, b_ref, y_ref, stats_ref, xpad_ref, *,
                           K, pad, T, V, Cin, Cout, Nb, compute_dtype):
    """One batch block of Nb elements.

    x_ref:     (Nb, Cin, T*V)      un-padded input, lane-dense (T*V on lanes)
    w_ref:     (Cout, K*Cin)       im2col weights, w_ref[o, k*Cin+i] == w_kio[k,i,o]
    b_ref:     (Cout, 1)           conv bias
    y_ref:     (Nb, Cout, T*V)     conv(+bias) output, lane-dense
    stats_ref: (Cout, 2)           grid-resident [sum, sum_sq] accumulator
    xpad_ref:  (Cin, (T+2*pad)*V)  VMEM scratch: zero-padded input of ONE element
    """
    TV = T * V
    halo = pad * V

    @pl.when(pl.program_id(0) == 0)
    def _init():
        stats_ref[...] = jnp.zeros_like(stats_ref)

    # In-kernel zero padding of the temporal halo (lane dimension).
    if halo > 0:
        zeros_halo = jnp.zeros((Cin, halo), dtype=xpad_ref.dtype)
        xpad_ref[:, pl.ds(0, halo)] = zeros_halo
        xpad_ref[:, pl.ds(halo + TV, halo)] = zeros_halo

    ssum = jnp.zeros((Cout, 1), jnp.float32)
    ssq = jnp.zeros((Cout, 1), jnp.float32)
    for b in range(Nb):                      # static unroll; Nb is small by construction
        xpad_ref[:, pl.ds(halo, TV)] = x_ref[b]
        # im2col: K lane-shifted windows stacked on the contraction (sublane) dim
        # -> one MXU matmul with a K*Cin-wide contraction, result already (Cout, TV).
        patch = jnp.concatenate(
            [xpad_ref[:, pl.ds(k * V, TV)] for k in range(K)], axis=0)
        ymat = jnp.dot(w_ref[...], patch.astype(compute_dtype),
                       preferred_element_type=jnp.float32)          # (Cout, TV) f32
        ymat = ymat + b_ref[...]                                     # conv bias
        y_ref[b] = ymat.astype(y_ref.dtype)                          # lane-dense store
        # Fused BN statistics while the tile is still in VMEM (single traversal).
        ssum = ssum + jnp.sum(ymat, axis=1, keepdims=True)
        ssq = ssq + jnp.sum(ymat * ymat, axis=1, keepdims=True)

    stats_ref[...] += jnp.concatenate([ssum, ssq], axis=1)           # (Cout, 2)


# -----------------------------------------------------------------------------
# Kernel 2: normalize pass.  Per-row (= per (n, channel)) affine; mean/var/gamma/
# beta pre-folded into (scale, shift) so y is read from HBM exactly once.
# -----------------------------------------------------------------------------
def _bn_normalize_kernel(y_ref, scale_ref, shift_ref, z_ref):
    # y_ref: (Rb, T*V) lane-dense rows; scale/shift: (Rb, 1) broadcast across lanes.
    z_ref[...] = (y_ref[...] * scale_ref[...] + shift_ref[...]).astype(z_ref.dtype)


# -----------------------------------------------------------------------------
# Wrapper
# -----------------------------------------------------------------------------
def _largest_divisor_leq(n, cap):
    cap = int(max(1, min(n, cap)))
    while n % cap:
        cap -= 1
    return cap


@functools.partial(
    jax.jit, static_argnames=("kernel_size", "stride", "eps", "compute_dtype"))
def unit_tcn_forward(x_nchw, w_kio, bias, gamma, beta, *, kernel_size=9, stride=1,
                     eps=1e-5, compute_dtype=jnp.bfloat16):
    """x_nchw: (N, Cin, T, V). w_kio: (K, Cin, Cout). Returns (N, Cout, T, V)."""
    assert stride == 1   # TODO(synk): stride > 1 temporal subsampling not implemented
    assert kernel_size % 2 == 1, "symmetric 'same' padding assumes odd kernel_size"

    N, Cin, T, V = x_nchw.shape
    K = kernel_size
    pad = (K - 1) // 2
    Cout = w_kio.shape[-1]
    TV = T * V

    # Layout plumbing: channels-first with flattened (T*V) lanes — a pure reshape,
    # no HBM relayout pass.  im2col weight: w_mat[o, k*Cin + i] == w_kio[k, i, o].
    x_cf = x_nchw.reshape(N, Cin, TV)
    w_mat = jnp.transpose(w_kio, (2, 0, 1)).reshape(Cout, K * Cin).astype(compute_dtype)
    b_mat = bias.reshape(Cout, 1).astype(jnp.float32)

    # Batch block: as many elements per grid step as fit a ~2 MiB working set
    # (amortizes per-step pipeline overhead; at the demo shape the whole batch is
    # a single step).
    per_elem_bytes = TV * (Cin * x_cf.dtype.itemsize + Cout * 4)
    Nb = _largest_divisor_leq(N, max(1, (2 << 20) // max(per_elem_bytes, 1)))

    conv_kernel = functools.partial(
        _tcn_conv_stats_kernel, K=K, pad=pad, T=T, V=V, Cin=Cin, Cout=Cout,
        Nb=Nb, compute_dtype=compute_dtype)

    y, stats = pl.pallas_call(
        conv_kernel,
        out_shape=(jax.ShapeDtypeStruct((N, Cout, TV), jnp.float32),
                   jax.ShapeDtypeStruct((Cout, 2), jnp.float32)),
        grid_spec=pltpu.PrefetchScalarGridSpec(
            num_scalar_prefetch=0,
            grid=(N // Nb,),
            in_specs=[
                pl.BlockSpec((Nb, Cin, TV), lambda n: (n, 0, 0)),
                pl.BlockSpec((Cout, K * Cin), lambda n: (0, 0)),   # resident weights
                pl.BlockSpec((Cout, 1), lambda n: (0, 0)),         # resident bias
            ],
            out_specs=[
                pl.BlockSpec((Nb, Cout, TV), lambda n: (n, 0, 0)),
                pl.BlockSpec((Cout, 2), lambda n: (0, 0)),         # resident accumulator
            ],
            scratch_shapes=[pltpu.VMEM((Cin, (T + 2 * pad) * V), x_cf.dtype)],
        ),
        # Batch-block axis is 'arbitrary' because the BN-stats accumulator is carried
        # across grid steps.
        # TODO(synk): per-core stat partials to regain megacore batch parallelism on
        # v7x; at real ST-GCN shapes (TV~7500, Cin>=64) add a TV tile axis or switch
        # to K accumulating matmuls so the im2col patch fits v7x's 64 MiB VMEM.
        compiler_params=pltpu.CompilerParams(
            dimension_semantics=("arbitrary",)),
    )(x_cf, w_mat, b_mat)

    # O(Cout) glue: fold batch statistics + gamma/beta into a per-channel affine.
    # TODO(synk): shifted sum-of-squares / Welford if cancellation bites at real
    # N*T*V with large channel means.
    cnt = float(N * TV)
    mean = stats[:, 0] / cnt
    var = jnp.maximum(stats[:, 1] / cnt - mean * mean, 0.0)        # biased variance
    inv = jax.lax.rsqrt(var + eps)
    scale_c = (gamma * inv).astype(jnp.float32)
    shift_c = (beta - mean * gamma * inv).astype(jnp.float32)

    # Normalize pass on big lane-dense row tiles: flatten to (N*Cout, T*V).
    rows = N * Cout
    y_flat = y.reshape(rows, TV)                                   # free reshape
    scale_rows = jnp.tile(scale_c, N).reshape(rows, 1)
    shift_rows = jnp.tile(shift_c, N).reshape(rows, 1)

    row_bytes = TV * 4 * 2                                         # read y + write z
    Rb = _largest_divisor_leq(rows, max(1, (8 << 20) // row_bytes))
    if Rb != rows and Rb % 8 != 0:
        Rb = rows                                                  # keep block legal

    z = pl.pallas_call(
        _bn_normalize_kernel,
        out_shape=jax.ShapeDtypeStruct((rows, TV), jnp.float32),
        grid_spec=pltpu.PrefetchScalarGridSpec(
            num_scalar_prefetch=0,
            grid=(rows // Rb,),
            in_specs=[
                pl.BlockSpec((Rb, TV), lambda r: (r, 0)),
                pl.BlockSpec((Rb, 1), lambda r: (r, 0)),
                pl.BlockSpec((Rb, 1), lambda r: (r, 0)),
            ],
            out_specs=pl.BlockSpec((Rb, TV), lambda r: (r, 0)),
        ),
        compiler_params=pltpu.CompilerParams(
            dimension_semantics=("parallel",)),
        input_output_aliases={0: 0},                               # overwrite y in place
    )(y_flat, scale_rows, shift_rows)

    # (N*Cout, T*V) is already NCHW up to a free reshape.
    return z.reshape(N, Cout, T, V)


# -----------------------------------------------------------------------------
# Pure-JAX reference for verification (mirrors the PyTorch module exactly).
# -----------------------------------------------------------------------------
def unit_tcn_reference(x_nchw, w_kio, bias, gamma, beta, *, kernel_size=9, eps=1e-5):
    N, Cin, T, V = x_nchw.shape
    K = kernel_size
    pad = (K - 1) // 2
    Cout = w_kio.shape[-1]
    x = jnp.transpose(x_nchw, (0, 2, 3, 1))
    x_pad = jnp.pad(x, ((0, 0), (pad, pad), (0, 0), (0, 0)))
    y = jnp.zeros((N, T, V, Cout), jnp.float32)
    for k in range(K):
        y = y + jnp.einsum("ntvi,io->ntvo", x_pad[:, k:k + T], w_kio[k])
    y = y + bias[None, None, None, :]
    mean = jnp.mean(y, axis=(0, 1, 2), keepdims=True)
    var = jnp.var(y, axis=(0, 1, 2), keepdims=True)
    z = (y - mean) * jax.lax.rsqrt(var + eps) * gamma + beta
    return jnp.transpose(z, (0, 3, 1, 2))


if __name__ == "__main__":
    # Small shapes: batch=2, in_channels=4, out_channels=8, T=16, V=16, K=9.
    N, Cin, Cout, T, V, K = 2, 4, 8, 16, 16, 9

    key = jax.random.PRNGKey(0)
    kx, kw, kb, kg, kbe = jax.random.split(key, 5)

    x = jax.random.normal(kx, (N, Cin, T, V), dtype=jnp.float32)

    # Conv weight: PyTorch (Cout, Cin, K, 1), kaiming_normal_(mode='fan_out'):
    # fan_out = Cout*K*1, std = sqrt(2/fan_out).  Stored directly as (K, Cin, Cout).
    std = (2.0 / (Cout * K * 1)) ** 0.5
    w = jax.random.normal(kw, (K, Cin, Cout), dtype=jnp.float32) * std
    bias = 0.1 * jax.random.normal(kb, (Cout,), dtype=jnp.float32)
    gamma = 1.0 + 0.1 * jax.random.normal(kg, (Cout,), dtype=jnp.float32)
    beta = 0.1 * jax.random.normal(kbe, (Cout,), dtype=jnp.float32)

    ref = unit_tcn_reference(x, w, bias, gamma, beta, kernel_size=K)

    # Default path: bf16 MXU operands (f32 accumulate) -> loose tolerance vs f32 ref.
    out = unit_tcn_forward(x, w, bias, gamma, beta, kernel_size=K, stride=1)
    out = jax.block_until_ready(out)
    assert out.shape == (N, Cout, T, V)
    assert jnp.allclose(out, ref, atol=3e-2, rtol=3e-2), "bf16 path mismatch vs reference"

    # f32 compute path: tight numerical check of the kernel structure itself.
    out_f32 = unit_tcn_forward(x, w, bias, gamma, beta, kernel_size=K, stride=1,
                               compute_dtype=jnp.float32)
    out_f32 = jax.block_until_ready(out_f32)
    assert jnp.allclose(out_f32, ref, atol=5e-4, rtol=5e-4), "f32 path mismatch vs reference"

    print("KERNEL_OK")
</pallas_src>

<mosaic_0001>
module attributes {stable_mosaic.version = 11 : i64} {
  func.func @_tcn_conv_stats_kernel(%arg0: i32, %arg1: memref<2x4x256xf32, #tpu.memory_space<vmem>>, %arg2: memref<8x36xbf16, #tpu.memory_space<vmem>>, %arg3: memref<8x1xf32, #tpu.memory_space<vmem>>, %arg4: memref<2x8x256xf32, #tpu.memory_space<vmem>>, %arg5: memref<8x2xf32, #tpu.memory_space<vmem>>, %arg6: memref<4x384xf32, #tpu.memory_space<vmem>>) attributes {dimension_semantics = [#tpu.dimension_semantics<arbitrary>], iteration_bounds = array<i64: 1>, scalar_prefetch = 0 : i64, scratch_operands = 1 : i64, tpu.core_type = #tpu.core_type<tc>, window_params = [{transform_indices = @transform_0, window_bounds = array<i64: 2, 4, 256>}, {pipeline_mode = #tpu.pipeline_mode<synchronous>, transform_indices = @transform_1, window_bounds = array<i64: 8, 36>}, {pipeline_mode = #tpu.pipeline_mode<synchronous>, transform_indices = @transform_2, window_bounds = array<i64: 8, 1>}, {transform_indices = @transform_3, window_bounds = array<i64: 2, 8, 256>}, {pipeline_mode = #tpu.pipeline_mode<synchronous>, transform_indices = @transform_4, window_bounds = array<i64: 8, 2>}]} {
    %c0_i32 = arith.constant 0 : i32
    %0 = arith.cmpi eq, %arg0, %c0_i32 : i32
    %1 = arith.extui %0 : i1 to i32
    %c0_i32_0 = arith.constant 0 : i32
    %2 = arith.cmpi ne, %1, %c0_i32_0 : i32
    scf.if %2 {
      %cst_66 = arith.constant 0.000000e+00 : f32
      %70 = vector.broadcast %cst_66 : f32 to vector<8x2xf32>
      %c0_67 = arith.constant 0 : index
      %c0_68 = arith.constant 0 : index
      %71 = vector.load %arg5[%c0_67, %c0_68] : memref<8x2xf32, #tpu.memory_space<vmem>>, vector<8x2xf32>
      tpu.vector_store %arg5[%c0_67, %c0_68], %70 {strides = array<i32>} : memref<8x2xf32, #tpu.memory_space<vmem>>, vector<8x2xf32>,
    } else {
    }
    %cst = arith.constant 0.000000e+00 : f32
    %3 = vector.broadcast %cst : f32 to vector<4x64xf32>
    %c0 = arith.constant 0 : index
    %c0_1 = arith.constant 0 : index
    %4 = vector.load %arg6[%c0, %c0_1] : memref<4x384xf32, #tpu.memory_space<vmem>>, vector<4x64xf32>
    tpu.vector_store %arg6[%c0, %c0_1], %3 {strides = array<i32>} : memref<4x384xf32, #tpu.memory_space<vmem>>, vector<4x64xf32>,
    %c0_2 = arith.constant 0 : index
    %c320 = arith.constant 320 : index
    %5 = vector.load %arg6[%c0_2, %c320] : memref<4x384xf32, #tpu.memory_space<vmem>>, vector<4x64xf32>
    tpu.vector_store %arg6[%c0_2, %c320], %3 {strides = array<i32>} : memref<4x384xf32, #tpu.memory_space<vmem>>, vector<4x64xf32>,
    %cst_3 = arith.constant 0.000000e+00 : f32
    %6 = vector.broadcast %cst_3 : f32 to vector<8x1xf32>
    %cst_4 = arith.constant 0.000000e+00 : f32
    %7 = vector.broadcast %cst_4 : f32 to vector<8x1xf32>
    %c0_5 = arith.constant 0 : index
    %c0_6 = arith.constant 0 : index
    %c0_7 = arith.constant 0 : index
    %8 = vector.load %arg1[%c0_5, %c0_6, %c0_7] : memref<2x4x256xf32, #tpu.memory_space<vmem>>, vector<1x4x256xf32>
    %9 = vector.shape_cast %8 : vector<1x4x256xf32> to vector<4x256xf32>
    %c0_8 = arith.constant 0 : index
    %c64 = arith.constant 64 : index
    %10 = vector.load %arg6[%c0_8, %c64] : memref<4x384xf32, #tpu.memory_space<vmem>>, vector<4x256xf32>
    tpu.vector_store %arg6[%c0_8, %c64], %9 {strides = array<i32>} : memref<4x384xf32, #tpu.memory_space<vmem>>, vector<4x256xf32>,
    %c0_9 = arith.constant 0 : index
    %c0_10 = arith.constant 0 : index
    %11 = vector.load %arg6[%c0_9, %c0_10] : memref<4x384xf32, #tpu.memory_space<vmem>>, vector<4x256xf32>
    %c0_11 = arith.constant 0 : index
    %c16 = arith.constant 16 : index
    %12 = vector.load %arg6[%c0_11, %c16] : memref<4x384xf32, #tpu.memory_space<vmem>>, vector<4x256xf32>
    %c0_12 = arith.constant 0 : index
    %c32 = arith.constant 32 : index
    %13 = vector.load %arg6[%c0_12, %c32] : memref<4x384xf32, #tpu.memory_space<vmem>>, vector<4x256xf32>
    %c0_13 = arith.constant 0 : index
    %c48 = arith.constant 48 : index
    %14 = vector.load %arg6[%c0_13, %c48] : memref<4x384xf32, #tpu.memory_space<vmem>>, vector<4x256xf32>
    %c0_14 = arith.constant 0 : index
    %c64_15 = arith.constant 64 : index
    %15 = vector.load %arg6[%c0_14, %c64_15] : memref<4x384xf32, #tpu.memory_space<vmem>>, vector<4x256xf32>
    %c0_16 = arith.constant 0 : index
    %c80 = arith.constant 80 : index
    %16 = vector.load %arg6[%c0_16, %c80] : memref<4x384xf32, #tpu.memory_space<vmem>>, vector<4x256xf32>
    %c0_17 = arith.constant 0 : index
    %c96 = arith.constant 96 : index
    %17 = vector.load %arg6[%c0_17, %c96] : memref<4x384xf32, #tpu.memory_space<vmem>>, vector<4x256xf32>
    %c0_18 = arith.constant 0 : index
    %c112 = arith.constant 112 : index
    %18 = vector.load %arg6[%c0_18, %c112] : memref<4x384xf32, #tpu.memory_space<vmem>>, vector<4x256xf32>
    %c0_19 = arith.constant 0 : index
    %c128 = arith.constant 128 : index
    %19 = vector.load %arg6[%c0_19, %c128] : memref<4x384xf32, #tpu.memory_space<vmem>>, vector<4x256xf32>
    %20 = tpu.concatenate %11, %12, %13, %14, %15, %16, %17, %18, %19 in 0 : vector<4x256xf32>, vector<4x256xf32>, vector<4x256xf32>, vector<4x256xf32>, vector<4x256xf32>, vector<4x256xf32>, vector<4x256xf32>, vector<4x256xf32>, vector<4x256xf32> -> vector<36x256xf32>
    %c0_20 = arith.constant 0 : index
    %c0_21 = arith.constant 0 : index
    %21 = vector.load %arg2[%c0_20, %c0_21] : memref<8x36xbf16, #tpu.memory_space<vmem>>, vector<8x36xbf16>
    %22 = arith.truncf %20 : vector<36x256xf32> to vector<36x256xbf16>
    %cst_22 = arith.constant dense<0.000000e+00> : vector<8x256xf32>
    %23 = tpu.matmul %21, %22, %cst_22 {dimension_numbers = #tpu.dot_dimension_numbers<[1], [0], [0], [1], [0, 0, 1, 1], [], []>} : vector<8x36xbf16>, vector<36x256xbf16>, vector<8x256xf32> -> vector<8x256xf32>
    %c0_23 = arith.constant 0 : index
    %c0_24 = arith.constant 0 : index
    %24 = vector.load %arg3[%c0_23, %c0_24] : memref<8x1xf32, #tpu.memory_space<vmem>>, vector<8x1xf32>
    %25 = vector.broadcast %24 : vector<8x1xf32> to vector<8x256xf32>
    %26 = arith.addf %23, %25 : vector<8x256xf32>
    %c0_25 = arith.constant 0 : index
    %c0_26 = arith.constant 0 : index
    %c0_27 = arith.constant 0 : index
    %27 = vector.load %arg4[%c0_25, %c0_26, %c0_27] : memref<2x8x256xf32, #tpu.memory_space<vmem>>, vector<1x8x256xf32>
    %28 = vector.shape_cast %27 : vector<1x8x256xf32> to vector<8x256xf32>
    %29 = vector.shape_cast %26 : vector<8x256xf32> to vector<1x8x256xf32>
    tpu.vector_store %arg4[%c0_25, %c0_26, %c0_27], %29 {strides = array<i32>} : memref<2x8x256xf32, #tpu.memory_space<vmem>>, vector<1x8x256xf32>,
    %cst_28 = arith.constant dense<0.000000e+00> : vector<8xf32>
    %30 = vector.multi_reduction <add>, %26, %cst_28 [1] : vector<8x256xf32> to vector<8xf32>
    %31 = vector.shape_cast %30 : vector<8xf32> to vector<8x1xf32>
    %32 = arith.addf %6, %31 : vector<8x1xf32>
    %33 = arith.mulf %26, %26 : vector<8x256xf32>
    %cst_29 = arith.constant dense<0.000000e+00> : vector<8xf32>
    %34 = vector.multi_reduction <add>, %33, %cst_29 [1] : vector<8x256xf32> to vector<8xf32>
    %35 = vector.shape_cast %34 : vector<8xf32> to vector<8x1xf32>
    %36 = arith.addf %7, %35 : vector<8x1xf32>
    %c1 = arith.constant 1 : index
    %c0_30 = arith.constant 0 : index
    %c0_31 = arith.constant 0 : index
    %37 = vector.load %arg1[%c1, %c0_30, %c0_31] : memref<2x4x256xf32, #tpu.memory_space<vmem>>, vector<1x4x256xf32>
    %38 = vector.shape_cast %37 : vector<1x4x256xf32> to vector<4x256xf32>
    %c0_32 = arith.constant 0 : index
    %c64_33 = arith.constant 64 : index
    %39 = vector.load %arg6[%c0_32, %c64_33] : memref<4x384xf32, #tpu.memory_space<vmem>>, vector<4x256xf32>
    tpu.vector_store %arg6[%c0_32, %c64_33], %38 {strides = array<i32>} : memref<4x384xf32, #tpu.memory_space<vmem>>, vector<4x256xf32>,
    %c0_34 = arith.constant 0 : index
    %c0_35 = arith.constant 0 : index
    %40 = vector.load %arg6[%c0_34, %c0_35] : memref<4x384xf32, #tpu.memory_space<vmem>>, vector<4x256xf32>
    %c0_36 = arith.constant 0 : index
    %c16_37 = arith.constant 16 : index
    %41 = vector.load %arg6[%c0_36, %c16_37] : memref<4x384xf32, #tpu.memory_space<vmem>>, vector<4x256xf32>
    %c0_38 = arith.constant 0 : index
    %c32_39 = arith.constant 32 : index
    %42 = vector.load %arg6[%c0_38, %c32_39] : memref<4x384xf32, #tpu.memory_space<vmem>>, vector<4x256xf32>
    %c0_40 = arith.constant 0 : index
    %c48_41 = arith.constant 48 : index
    %43 = vector.load %arg6[%c0_40, %c48_41] : memref<4x384xf32, #tpu.memory_space<vmem>>, vector<4x256xf32>
    %c0_42 = arith.constant 0 : index
    %c64_43 = arith.constant 64 : index
    %44 = vector.load %arg6[%c0_42, %c64_43] : memref<4x384xf32, #tpu.memory_space<vmem>>, vector<4x256xf32>
    %c0_44 = arith.constant 0 : index
    %c80_45 = arith.constant 80 : index
    %45 = vector.load %arg6[%c0_44, %c80_45] : memref<4x384xf32, #tpu.memory_space<vmem>>, vector<4x256xf32>
    %c0_46 = arith.constant 0 : index
    %c96_47 = arith.constant 96 : index
    %46 = vector.load %arg6[%c0_46, %c96_47] : memref<4x384xf32, #tpu.memory_space<vmem>>, vector<4x256xf32>
    %c0_48 = arith.constant 0 : index
    %c112_49 = arith.constant 112 : index
    %47 = vector.load %arg6[%c0_48, %c112_49] : memref<4x384xf32, #tpu.memory_space<vmem>>, vector<4x256xf32>
    %c0_50 = arith.constant 0 : index
    %c128_51 = arith.constant 128 : index
    %48 = vector.load %arg6[%c0_50, %c128_51] : memref<4x384xf32, #tpu.memory_space<vmem>>, vector<4x256xf32>
    %49 = tpu.concatenate %40, %41, %42, %43, %44, %45, %46, %47, %48 in 0 : vector<4x256xf32>, vector<4x256xf32>, vector<4x256xf32>, vector<4x256xf32>, vector<4x256xf32>, vector<4x256xf32>, vector<4x256xf32>, vector<4x256xf32>, vector<4x256xf32> -> vector<36x256xf32>
    %c0_52 = arith.constant 0 : index
    %c0_53 = arith.constant 0 : index
    %50 = vector.load %arg2[%c0_52, %c0_53] : memref<8x36xbf16, #tpu.memory_space<vmem>>, vector<8x36xbf16>
    %51 = arith.truncf %49 : vector<36x256xf32> to vector<36x256xbf16>
    %cst_54 = arith.constant dense<0.000000e+00> : vector<8x256xf32>
    %52 = tpu.matmul %50, %51, %cst_54 {dimension_numbers = #tpu.dot_dimension_numbers<[1], [0], [0], [1], [0, 0, 1, 1], [], []>} : vector<8x36xbf16>, vector<36x256xbf16>, vector<8x256xf32> -> vector<8x256xf32>
    %c0_55 = arith.constant 0 : index
    %c0_56 = arith.constant 0 : index
    %53 = vector.load %arg3[%c0_55, %c0_56] : memref<8x1xf32, #tpu.memory_space<vmem>>, vector<8x1xf32>
    %54 = vector.broadcast %53 : vector<8x1xf32> to vector<8x256xf32>
    %55 = arith.addf %52, %54 : vector<8x256xf32>
    %c1_57 = arith.constant 1 : index
    %c0_58 = arith.constant 0 : index
    %c0_59 = arith.constant 0 : index
    %56 = vector.load %arg4[%c1_57, %c0_58, %c0_59] : memref<2x8x256xf32, #tpu.memory_space<vmem>>, vector<1x8x256xf32>
    %57 = vector.shape_cast %56 : vector<1x8x256xf32> to vector<8x256xf32>
    %58 = vector.shape_cast %55 : vector<8x256xf32> to vector<1x8x256xf32>
    tpu.vector_store %arg4[%c1_57, %c0_58, %c0_59], %58 {strides = array<i32>} : memref<2x8x256xf32, #tpu.memory_space<vmem>>, vector<1x8x256xf32>,
    %cst_60 = arith.constant dense<0.000000e+00> : vector<8xf32>
    %59 = vector.multi_reduction <add>, %55, %cst_60 [1] : vector<8x256xf32> to vector<8xf32>
    %60 = vector.shape_cast %59 : vector<8xf32> to vector<8x1xf32>
    %61 = arith.addf %32, %60 : vector<8x1xf32>
    %62 = arith.mulf %55, %55 : vector<8x256xf32>
    %cst_61 = arith.constant dense<0.000000e+00> : vector<8xf32>
    %63 = vector.multi_reduction <add>, %62, %cst_61 [1] : vector<8x256xf32> to vector<8xf32>
    %64 = vector.shape_cast %63 : vector<8xf32> to vector<8x1xf32>
    %65 = arith.addf %36, %64 : vector<8x1xf32>
    %c0_62 = arith.constant 0 : index
    %c0_63 = arith.constant 0 : index
    %66 = vector.load %arg5[%c0_62, %c0_63] : memref<8x2xf32, #tpu.memory_space<vmem>>, vector<8x2xf32>
    %67 = tpu.concatenate %61, %65 in 1 : vector<8x1xf32>, vector<8x1xf32> -> vector<8x2xf32>
    %68 = arith.addf %66, %67 : vector<8x2xf32>
    %c0_64 = arith.constant 0 : index
    %c0_65 = arith.constant 0 : index
    %69 = vector.load %arg5[%c0_64, %c0_65] : memref<8x2xf32, #tpu.memory_space<vmem>>, vector<8x2xf32>
    tpu.vector_store %arg5[%c0_64, %c0_65], %68 {strides = array<i32>} : memref<8x2xf32, #tpu.memory_space<vmem>>, vector<8x2xf32>,
    return
  }
  func.func @transform_0(%arg0: i32) -> (i32, i32, i32) {
    %c0_i32 = arith.constant 0 : i32
    %c0_i32_0 = arith.constant 0 : i32
    %c0_i32_1 = arith.constant 0 : i32
    return %arg0, %c0_i32, %c0_i32_0 : i32, i32, i32
  }
  func.func @transform_1(%arg0: i32) -> (i32, i32) {
    %c0_i32 = arith.constant 0 : i32
    %c0_i32_0 = arith.constant 0 : i32
    %c0_i32_1 = arith.constant 0 : i32
    return %c0_i32, %c0_i32_0 : i32, i32
  }
  func.func @transform_2(%arg0: i32) -> (i32, i32) {
    %c0_i32 = arith.constant 0 : i32
    %c0_i32_0 = arith.constant 0 : i32
    %c0_i32_1 = arith.constant 0 : i32
    return %c0_i32, %c0_i32_0 : i32, i32
  }
  func.func @transform_3(%arg0: i32) -> (i32, i32, i32) {
    %c0_i32 = arith.constant 0 : i32
    %c0_i32_0 = arith.constant 0 : i32
    %c0_i32_1 = arith.constant 0 : i32
    return %arg0, %c0_i32, %c0_i32_0 : i32, i32, i32
  }
  func.func @transform_4(%arg0: i32) -> (i32, i32) {
    %c0_i32 = arith.constant 0 : i32
    %c0_i32_0 = arith.constant 0 : i32
    %c0_i32_1 = arith.constant 0 : i32
    return %c0_i32, %c0_i32_0 : i32, i32
  }
}

module attributes {stable_mosaic.version = 11 : i64} {
  func.func @_bn_normalize_kernel(%arg0: i32, %arg1: memref<16x256xf32, #tpu.memory_space<vmem>>, %arg2: memref<16x1xf32, #tpu.memory_space<vmem>>, %arg3: memref<16x1xf32, #tpu.memory_space<vmem>>, %arg4: memref<16x256xf32, #tpu.memory_space<vmem>>) attributes {dimension_semantics = [#tpu.dimension_semantics<parallel>], iteration_bounds = array<i64: 1>, scalar_prefetch = 0 : i64, scratch_operands = 0 : i64, tpu.core_type = #tpu.core_type<tc>, window_params = [{transform_indices = @transform_0, window_bounds = array<i64: 16, 256>}, {transform_indices = @transform_1, window_bounds = array<i64: 16, 1>}, {transform_indices = @transform_2, window_bounds = array<i64: 16, 1>}, {transform_indices = @transform_3, window_bounds = array<i64: 16, 256>}]} {
    %c0 = arith.constant 0 : index
    %c0_0 = arith.constant 0 : index
    %0 = vector.load %arg1[%c0, %c0_0] : memref<16x256xf32, #tpu.memory_space<vmem>>, vector<16x256xf32>
    %c0_1 = arith.constant 0 : index
    %c0_2 = arith.constant 0 : index
    %1 = vector.load %arg2[%c0_1, %c0_2] : memref<16x1xf32, #tpu.memory_space<vmem>>, vector<16x1xf32>
    %2 = vector.broadcast %1 : vector<16x1xf32> to vector<16x256xf32>
    %3 = arith.mulf %0, %2 : vector<16x256xf32>
    %c0_3 = arith.constant 0 : index
    %c0_4 = arith.constant 0 : index
    %4 = vector.load %arg3[%c0_3, %c0_4] : memref<16x1xf32, #tpu.memory_space<vmem>>, vector<16x1xf32>
    %5 = vector.broadcast %4 : vector<16x1xf32> to vector<16x256xf32>
    %6 = arith.addf %3, %5 : vector<16x256xf32>
    %c0_5 = arith.constant 0 : index
    %c0_6 = arith.constant 0 : index
    %7 = vector.load %arg4[%c0_5, %c0_6] : memref<16x256xf32, #tpu.memory_space<vmem>>, vector<16x256xf32>
    tpu.vector_store %arg4[%c0_5, %c0_6], %6 {strides = array<i32>} : memref<16x256xf32, #tpu.memory_space<vmem>>, vector<16x256xf32>,
    return
  }
  func.func @transform_0(%arg0: i32) -> (i32, i32) {
    %c0_i32 = arith.constant 0 : i32
    %c0_i32_0 = arith.constant 0 : i32
    return %arg0, %c0_i32 : i32, i32
  }
  func.func @transform_1(%arg0: i32) -> (i32, i32) {
    %c0_i32 = arith.constant 0 : i32
    %c0_i32_0 = arith.constant 0 : i32
    return %arg0, %c0_i32 : i32, i32
  }
  func.func @transform_2(%arg0: i32) -> (i32, i32) {
    %c0_i32 = arith.constant 0 : i32
    %c0_i32_0 = arith.constant 0 : i32
    return %arg0, %c0_i32 : i32, i32
  }
  func.func @transform_3(%arg0: i32) -> (i32, i32) {
    %c0_i32 = arith.constant 0 : i32
    %c0_i32_0 = arith.constant 0 : i32
    return %arg0, %c0_i32 : i32, i32
  }
}

</mosaic_0001>

<bundles_post_ra>
// kernel: tile.18
= control target key start
LH: loop header
LB: loop body
LE: loop exit
PB: predicated region body
PF: predicated region fallthrough
CT: control target
= control target key end

     0   :  { %s22_s0 = inlined_call_operand.vmem [shape: f32[8], index: 0, kind: input, shape index: {}]   ;;  %s23_s1 = inlined_call_operand.vmem [shape: f32[2,8], index: 1, kind: output, shape index: {}]  }
   0x1   :  { %v4_v0 = vld [vmem:[%s22_s0] ss:$0 sm:$0xff] }
   0x2   :  { %5 = vst [vmem:[%s23_s1] sm:$0x3] %v4_v0 }

// kernel: tile.0
= control target key start
LH: loop header
LB: loop body
LE: loop exit
PB: predicated region body
PF: predicated region fallthrough
CT: control target
= control target key end

     0   :  { %s66_s8 = smov 125   ;;  %vm7_vm0 = vcmask 7168   ;;  %s67_s11 = smov 126   ;;  %s117_s0 = inlined_call_operand.vmem [shape: f32[2,8], index: 0, kind: input, shape index: {}]   ;;  %s118_s1 = inlined_call_operand.vmem [shape: f32[16,1], index: 1, kind: output, shape index: {}]  }
   0x1   :  { %v4_v0 = vld [vmem:[%s117_s0] sm:$0x3]  ;;  %s65_s0 = smov 127   ;;  %s68_s12 = smov 124  }
   0x2   :  { %5 = vst [vmem:[#allocation0] sm:$0x3] %v4_v0  ;;  %s69_s13 = smov 123   ;;  %s70_s14 = smov 122  }
   0x3   :  { %s71_s15 = smov 121  }
   0x9   :  { %v9_v1 = vld [vmem:[#allocation0] sm:$0x3]  }
   0xa   :  { %v21_v2 = vld [vmem:[#allocation0] sm:$0x3]   ;;  %10 = vrot.lane.b32.xlu0 %v9_v1, %s65_s0 }
   0xb   :  { %22 = vrot.lane.b32.xlu1 %v21_v2, %s66_s8  ;;  %v15_v3 = vld [vmem:[#allocation0] sm:$0x3]  }
   0xc   :  { %v27_v4 = vld [vmem:[#allocation0] sm:$0x3]  }
   0xd   :  { %v6_v5 = vld [vmem:[#allocation0] sm:$0x3]  }
   0xe   :  { %8 = vst.msk [vmem:[%s118_s1] ss:$8 sm:$0x3] %vm7_vm0, %v6_v5   ;;  %16 = vrot.lane.b32.xlu0 %v15_v3, %s67_s11  ;;  %v33_v6 = vld [vmem:[#allocation0] sm:$0x3]  }
   0xf   :  { %28 = vrot.lane.b32.xlu1 %v27_v4, %s68_s12  ;;  %v39_v7 = vld [vmem:[#allocation0] sm:$0x3]  }
  0x10   :  { %v45_v8 = vld [vmem:[#allocation0] sm:$0x3]  }
  0x12   :  { %34 = vrot.lane.b32.xlu0 %v33_v6, %s69_s13 }
  0x13   :  { %40 = vrot.lane.b32.xlu1 %v39_v7, %s70_s14 }
  0x16   :  { %46 = vrot.lane.b32.xlu0 %v45_v8, %s71_s15 }
  0x7c   :  { %v11_v9 = vpop.permute.xlu0 %10  }
  0x7d   :  { %v23_v10 = vpop.permute.xlu1 %22   ;;  %51 = vst.msk [vmem:[%s118_s1 + $0x1] ss:$8 sm:$0x3] %vm7_vm0, %v11_v9  }
  0x7e   :  { %53 = vst.msk [vmem:[%s118_s1 + $0x3] ss:$8 sm:$0x3] %vm7_vm0, %v23_v10  }
  0x80   :  { %v17_v11 = vpop.permute.xlu0 %16  }
  0x81   :  { %v29_v12 = vpop.permute.xlu1 %28   ;;  %52 = vst.msk [vmem:[%s118_s1 + $0x2] ss:$8 sm:$0x3] %vm7_vm0, %v17_v11  }
  0x82   :  { %54 = vst.msk [vmem:[%s118_s1 + $0x4] ss:$8 sm:$0x3] %vm7_vm0, %v29_v12  }
  0x84   :  { %v35_v13 = vpop.permute.xlu0 %34  }
  0x85   :  { %v41_v14 = vpop.permute.xlu1 %40   ;;  %55 = vst.msk [vmem:[%s118_s1 + $0x5] ss:$8 sm:$0x3] %vm7_vm0, %v35_v13  }
  0x86   :  { %56 = vst.msk [vmem:[%s118_s1 + $0x6] ss:$8 sm:$0x3] %vm7_vm0, %v41_v14  }
  0x88   :  { %v47_v15 = vpop.permute.xlu0 %46  }
  0x89   :  { %57 = vst.msk [vmem:[%s118_s1 + $0x7] ss:$8 sm:$0x3] %vm7_vm0, %v47_v15  }

// kernel: unit_tcn_forward.3
= control target key start
LH: loop header
LB: loop body
LE: loop exit
PB: predicated region body
PF: predicated region fallthrough
CT: control target
= control target key end

     0   :  { %v61_v0 = vmov 0   ;;  %s118_s2 = inlined_call_operand.vmem [shape: f32[16,1], index: 2, kind: input, shape index: {}]   ;;  %s119_s1 = inlined_call_operand.vmem [shape: f32[16,1], index: 1, kind: input, shape index: {}]   ;;  %s120_s0 = inlined_call_operand.vmem [shape: f32[16,256], index: 0, kind: input, shape index: {}, may-alias: {0,3}]   ;;  %s121_s3 = inlined_call_operand.vmem [shape: f32[16,256], index: 3, kind: output, shape index: {}, may-alias: {0,3}]  }
   0x1   :  { %60 = vset.pattern.permute.xlu1 %v61_v0  ;;  %59 = vset.pattern.permute.xlu0 %v61_v0  ;;  %v34_v1 = vld [vmem:[%s118_s2] sm:$0xff]  ;;  %v35_v3 = vld [vmem:[%s118_s2 + $0x8] sm:$0xff]  ;;  %v16_v11 = vld [vmem:[%s120_s0 + $0x10] sm:$0xff] }
   0x2   :  { %v18_v2 = vld [vmem:[%s119_s1] sm:$0xff]  ;;  %38 = vperm.xlu1 %60, %v34_v1   ;;  %v19_v4 = vld [vmem:[%s119_s1 + $0x8] sm:$0xff]  ;;  %v17_v12 = vld [vmem:[%s120_s0 + $0x18] sm:$0xff] }
   0x3   :  { %22 = vperm.xlu0 %59, %v18_v2   ;;  %v14_v5 = vld [vmem:[%s120_s0] sm:$0xff]  ;;  %v15_v6 = vld [vmem:[%s120_s0 + $0x8] sm:$0xff] }
   0x6   :  { %43 = vperm.xlu1 %60, %v35_v3  }
   0x7   :  { %27 = vperm.xlu0 %59, %v19_v4  }
  0x81   :  { %v39_v7 = vpop.permute.xlu1 %38 }
  0x82   :  { %v23_v8 = vpop.permute.xlu0 %22 }
  0x83   :  { %v30_v9 = vmul.f32 %v23_v8, %v14_v5  ;;  %v31_v10 = vmul.f32 %v23_v8, %v15_v6 }
  0x85   :  { %v46_v13 = vadd.f32 %v39_v7, %v30_v9  ;;  %v47_v14 = vadd.f32 %v39_v7, %v31_v10  ;;  %v44_v18 = vpop.permute.xlu1 %43 }
  0x86   :  { %v28_v15 = vpop.permute.xlu0 %27 }
  0x87   :  { %50 = vst [vmem:[%s121_s3] sm:$0xff] %v46_v13  ;;  %51 = vst [vmem:[%s121_s3 + $0x8] sm:$0xff] %v47_v14  ;;  %v32_v16 = vmul.f32 %v28_v15, %v16_v11  ;;  %v33_v17 = vmul.f32 %v28_v15, %v17_v12 }
  0x89   :  { %v48_v19 = vadd.f32 %v44_v18, %v32_v16  ;;  %v49_v20 = vadd.f32 %v44_v18, %v33_v17 }
  0x8b   :  { %52 = vst [vmem:[%s121_s3 + $0x10] sm:$0xff] %v48_v19  ;;  %53 = vst [vmem:[%s121_s3 + $0x18] sm:$0xff] %v49_v20 }

// kernel: unit_tcn_forward.2
= control target key start
LH: loop header
LB: loop body
LE: loop exit
PB: predicated region body
PF: predicated region fallthrough
CT: control target
= control target key end

     0   :  { %vm23_vm0 = vcmask 519168   ;;  %vm25_vm1 = vcmask 1043968   ;;  %v538_v1 = vmov 0.0   ;;  %s539_s17 = smov 64   ;;  %vm36_vm2 = vcmask 1047556   ;;  %s541_s20 = smov 112   ;;  %s740_s0 = inlined_call_operand.vmem [shape: f32[2,4,256], index: 0, kind: input, shape index: {}]   ;;  %s741_s2 = inlined_call_operand.vmem [shape: f32[8,1], index: 2, kind: input, shape index: {}]   ;;  %s742_s1 = inlined_call_operand.vmem [shape: bf16[8,36], index: 1, kind: input, shape index: {}]   ;;  %s743_s3 = inlined_call_operand.vmem [shape: f32[2,8,256], index: 3, kind: output, shape index: {0}]   ;;  %s744_s4 = inlined_call_operand.vmem [shape: f32[8,2], index: 4, kind: output, shape index: {1}]  }
   0x1   :  { %v27_v0 = vld [vmem:[%s740_s0] sm:$0xff]  ;;  %24 = vst.msk [vmem:[#allocation2] sm:$0xf] %vm23_vm0, %v538_v1  ;;  %v413_v2 = vld [vmem:[%s740_s0 + $0x8] sm:$0xff]  ;;  %vm32_vm3 = vcmask 523264   ;;  %vm37_vm4 = vmor %vm36_vm2, %vm25_vm1  ;;  %s540_s0 = smov 80  }
   0x2   :  { %26 = vst.msk [vmem:[#allocation2 + $0x8] sm:$0xf] %vm25_vm1, %v538_v1  ;;  %29 = vrot.lane.b32.xlu0 %v27_v0, %s539_s17  ;;  %s542_s21 = smov 48   ;;  %s543_s22 = smov 96   ;;  %v546_v26 = vmov 0   ;;  %v147_v27 = vld [vmem:[%s741_s2] sm:$0xff] }
   0x3   :  { %s544_s23 = smov 16   ;;  %s545_s24 = smov 32   ;;  %196 = vmatprep.mubr.bf16.mxu0 %v546_v26  ;;  %375 = vmatprep.mubr.bf16.mxu1 %v546_v26  ;;  %vm57_vm5 = vcmask 916480   ;;  %vm69_vm6 = vcmask 785408   ;;  %vm80_vm7 = vcmask 654336   ;;  %vm131_vm8 = vcmask 1043456  }
   0x4   :  { %532 = vset.pattern.permute.xlu1 %v546_v26  ;;  %533 = vset.pattern.permute.xlu0 %v546_v26  ;;  %vm112_vm9 = vcmask 261120   ;;  %vm123_vm10 = vcmask 130048   ;;  %vm101_vm11 = vcmask 392192   ;;  %vm157_vm12 = vcmask 1041408  }
   0x5   :  { %vm153_vm13 = vcmask 293888   ;;  %vm21_vm14 = vcmask 15360   ;;  %vm398_vm15 = vcmask 7168  }
   0x6   :  { %220 = vrot.lane.b32.xlu0 %v413_v2, %s539_s17  ;;  %22 = vst.msk [vmem:[%s744_s4] sm:$0xff] %vm21_vm14, %v538_v1 }
  0x74   :  { %v30_v3 = vpop.permute.xlu0 %29 }
  0x75   :  { %v31_v4 = vrot.slane %v30_v3, 4 }
  0x77   :  { %v33_v5 = vsel %vm32_vm3, %v31_v4, %v30_v3  ;;  %39 = vst.msk [vmem:[#allocation2 + $0x8] sm:$0xf] %vm23_vm0, %v31_v4 }
  0x78   :  { %38 = vst.msk [vmem:[#allocation2] sm:$0xff] %vm37_vm4, %v33_v5  ;;  %v221_v6 = vpop.permute.xlu0 %220 }
  0x79   :  { %v222_v7 = vrot.slane %v221_v6, 4 }
  0x7b   :  { %v223_v8 = vsel %vm32_vm3, %v222_v7, %v221_v6 }
  0x7e   :  { %v42_v9 = vld [vmem:[#allocation2 + $0x8] sm:$0xf] }
  0x7f   :  { %v586_v10 = vld [vmem:[#allocation2] sm:$0xff]  ;;  %v50_v12 = vcombine.low %v42_v9, %v42_v9 }
  0x80   :  { %v588_v11 = vld [vmem:[#allocation2 + $0x4] sm:$0xff]  ;;  %v594_v14 = vcombine.high %v586_v10, %v586_v10  ;;  %v49_v21 = vcombine.low %v586_v10, %v586_v10 }
  0x81   :  { %226 = vst.msk [vmem:[#allocation2] sm:$0xff] %vm37_vm4, %v223_v8  ;;  %v432_v13 = vpack.i.bf16 %v50_v12, %v586_v10 }
  0x82   :  { %227 = vst.msk [vmem:[#allocation2 + $0x8] sm:$0xf] %vm23_vm0, %v222_v7  ;;  %v447_v15 = vpack.i.bf16 %v42_v9, %v594_v14 }
  0x83   :  { %433 = vrot.lane.b32.xlu0 %v432_v13, %s540_s0  ;;  %428 = vrot.lane.b32.xlu1 %v432_v13, %s541_s20 }
  0x87   :  { %438 = vrot.lane.b32.xlu0 %v432_v13, %s542_s21  ;;  %448 = vrot.lane.b32.xlu1 %v447_v15, %s543_s22 }
  0x88   :  { %v598_v16 = vld [vmem:[#allocation2] sm:$0xff] }
  0x89   :  { %v602_v17 = vcombine.high %v598_v16, %v598_v16  ;;  %v230_v18 = vld [vmem:[#allocation2 + $0x8] sm:$0xf]  ;;  %v237_v20 = vcombine.low %v598_v16, %v598_v16  ;;  %v462_v22 = vpack.i.bf16 %v598_v16, %v586_v10 }
  0x8a   :  { %v238_v24 = vcombine.low %v230_v18, %v230_v18 }
  0x8b   :  { %443 = vrot.lane.b32.xlu0 %v432_v13, %s544_s23  ;;  %453 = vrot.lane.b32.xlu1 %v447_v15, %s539_s17  ;;  %v477_v19 = vpack.i.bf16 %v230_v18, %v602_v17  ;;  %v487_v23 = vpack.i.bf16 %v237_v20, %v49_v21 }
  0x8c   :  { %v472_v25 = vpack.i.bf16 %v238_v24, %v598_v16 }
  0x8f   :  { %458 = vrot.lane.b32.xlu1 %v447_v15, %s545_s24  ;;  %478 = vrot.lane.b32.xlu0 %v477_v19, %s543_s22 }
  0x93   :  { %463 = vrot.lane.b32.xlu1 %v462_v22, %s543_s22  ;;  %488 = vrot.lane.b32.xlu0 %v487_v23, %s541_s20 }
  0x97   :  { %468 = vrot.lane.b32.xlu1 %v462_v22, %s539_s17  ;;  %493 = vrot.lane.b32.xlu0 %v487_v23, %s540_s0 }
  0x9b   :  { %473 = vrot.lane.b32.xlu1 %v472_v25, %s541_s20  ;;  %503 = vrot.lane.b32.xlu0 %v472_v25, %s542_s21 }
  0x9f   :  { %483 = vrot.lane.b32.xlu1 %v472_v25, %s540_s0  ;;  %518 = vrot.lane.b32.xlu0 %v472_v25, %s544_s23 }
  0xa3   :  { %498 = vrot.lane.b32.xlu1 %v477_v19, %s539_s17  ;;  %523 = vrot.lane.b32.xlu0 %v487_v23, %s542_s21 }
  0xa7   :  { %508 = vrot.lane.b32.xlu1 %v477_v19, %s545_s24  ;;  %528 = vrot.lane.b32.xlu0 %v487_v23, %s544_s23 }
  0xab   :  { %513 = vrot.lane.b32.xlu1 %v462_v22, %s545_s24  ;;  %331 = vperm.xlu0 %533, %v147_v27  }
  0xaf   :  { %150 = vperm.xlu1 %532, %v147_v27  }
  0xf5   :  { %v429_v28 = vpop.permute.xlu1 %428  ;;  %v434_v29 = vpop.permute.xlu0 %433 }
  0xf6   :  { %v431_v30 = vunpack.i.h.bf16 %v429_v28  ;;  %v430_v31 = vunpack.i.l.bf16 %v429_v28  ;;  %v436_v32 = vunpack.i.h.bf16 %v434_v29  ;;  %v435_v33 = vunpack.i.l.bf16 %v434_v29 }
  0xf8   :  { %v59_v38 = vsel %vm57_vm5, %v430_v31, %v431_v30  ;;  %v82_v40 = vsel %vm80_vm7, %v435_v33, %v436_v32 }
  0xf9   :  { %v449_v34 = vpop.permute.xlu1 %448  ;;  %v620_v35 = vpop.permute.xlu0 %438  ;;  %v133_v44 = vsel %vm131_vm8, %v594_v14, %v59_v38 }
  0xfa   :  { %v451_v36 = vunpack.i.h.bf16 %v449_v34  ;;  %v450_v37 = vunpack.i.l.bf16 %v449_v34  ;;  %v441_v60 = vunpack.i.h.bf16 %v620_v35  ;;  %v440_v61 = vunpack.i.l.bf16 %v620_v35 }
  0xfc   :  { %v71_v39 = vsel %vm69_vm6, %v450_v37, %v451_v36  ;;  %v103_v12 = vsel %vm101_vm11, %v440_v61, %v441_v60 }
  0xfd   :  { %v625_v41 = vpop.permute.xlu1 %453  ;;  %v627_v42 = vpop.permute.xlu0 %443  ;;  %v135_v43 = vsel %vm131_vm8, %v71_v39, %v82_v40 }
  0xfe   :  { %v142_v45 = vpack.c.bf16 %v135_v43, %v133_v44  ;;  %v456_v52 = vunpack.i.h.bf16 %v625_v41  ;;  %v455_v54 = vunpack.i.l.bf16 %v625_v41  ;;  %v446_v55 = vunpack.i.h.bf16 %v627_v42 }
  0xff   :  { %v445_v56 = vunpack.i.l.bf16 %v627_v42 }
 0x100   :  { %164 = vmatprep.subr.bf16.mxu0 %v142_v45  ;;  %v92_v2 = vsel %vm32_vm3, %v455_v54, %v456_v52 }
 0x101   :  { %v632_v46 = vpop.permute.xlu1 %458  ;;  %v479_v47 = vpop.permute.xlu0 %478  ;;  %v125_v3 = vsel %vm123_vm10, %v445_v56, %v446_v55  ;;  %v137_v19 = vsel %vm131_vm8, %v92_v2, %v103_v12 }
 0x102   :  { %v461_v50 = vunpack.i.h.bf16 %v632_v46  ;;  %v460_v51 = vunpack.i.l.bf16 %v632_v46  ;;  %v481_v20 = vunpack.i.h.bf16 %v479_v47  ;;  %v480_v21 = vunpack.i.l.bf16 %v479_v47 }
 0x103   :  { %v145_v46 = vpack.c.bf16 %v588_v11, %v588_v11 }
 0x104   :  { %v114_v62 = vsel %vm112_vm9, %v460_v51, %v461_v50 }
 0x105   :  { %v464_v48 = vpop.permute.xlu1 %463  ;;  %v489_v49 = vpop.permute.xlu0 %488  ;;  %v139_v9 = vsel %vm131_vm8, %v114_v62, %v125_v3 }
 0x106   :  { %v490_v53 = vunpack.i.l.bf16 %v489_v49  ;;  %v465_v57 = vunpack.i.l.bf16 %v464_v48  ;;  %v466_v22 = vunpack.i.h.bf16 %v464_v48  ;;  %v144_v23 = vpack.c.bf16 %v139_v9, %v137_v19 }
 0x107   :  { %v491_v24 = vunpack.i.h.bf16 %v489_v49 }
 0x108   :  { %v58_v0 = vsel %vm57_vm5, %v490_v53, %v430_v31  ;;  %v70_v4 = vsel %vm69_vm6, %v465_v57, %v450_v37  ;;  %v257_v31 = vsel %vm69_vm6, %v480_v21, %v481_v20 }
 0x109   :  { %v640_v58 = vpop.permute.xlu1 %468  ;;  %v494_v59 = vpop.permute.xlu0 %493  ;;  %v132_v13 = vsel %vm131_vm8, %v586_v10, %v58_v0 }
 0x10a   :  { %v495_v63 = vunpack.i.l.bf16 %v494_v59  ;;  %v496_v27 = vunpack.i.h.bf16 %v494_v59  ;;  %v470_v0 = vunpack.i.l.bf16 %v640_v58 }
 0x10c   :  { %v81_v5 = vsel %vm80_vm7, %v495_v63, %v435_v33  ;;  %v256_v33 = vsel %vm69_vm6, %v466_v22, %v480_v21  ;;  %v91_v20 = vsel %vm32_vm3, %v470_v0, %v455_v54  ;;  %v129_v21 = vcombine.high %v588_v11, %v588_v11 }
 0x10d   :  { %v474_v6 = vpop.permute.xlu1 %473  ;;  %v656_v7 = vpop.permute.xlu0 %503  ;;  %v134_v8 = vsel %vm131_vm8, %v70_v4, %v81_v5 }
 0x10e   :  { %v476_v14 = vunpack.i.h.bf16 %v474_v6  ;;  %v475_v15 = vunpack.i.l.bf16 %v474_v6  ;;  %v141_v18 = vpack.c.bf16 %v134_v8, %v132_v13  ;;  %v506_v47 = vunpack.i.h.bf16 %v656_v7 }
 0x10f   :  { %v505_v48 = vunpack.i.l.bf16 %v656_v7  ;;  %v231_v7 = vld [vmem:[#allocation2 + $0x4] sm:$0xff] }
 0x110   :  { %165 = vmatpush1.bf16.msra.mxu0 %v141_v18  ;;  %v246_v30 = vsel %vm57_vm5, %v475_v15, %v476_v14  ;;  %v245_v10 = vsel %vm57_vm5, %v491_v24, %v475_v15  ;;  %v311_v35 = vcombine.high %v231_v7, %v231_v7 }
 0x111   :  { %v484_v25 = vpop.permute.xlu1 %483  ;;  %v519_v26 = vpop.permute.xlu0 %518  ;;  %166 = vmatprep.subr.bf16.mxu0 %v144_v23  ;;  %v314_v44 = vsel %vm131_vm8, %v602_v17, %v246_v30  ;;  %v313_v45 = vsel %vm131_vm8, %v598_v16, %v245_v10  ;;  %v471_v16 = vunpack.i.h.bf16 %v640_v58  ;;  %v287_v2 = vsel %vm101_vm11, %v505_v48, %v506_v47  ;;  %v140_v10 = vld [vmem:[%s742_s1] sm:$0xf] }
 0x112   :  { %v486_v28 = vunpack.i.h.bf16 %v484_v25  ;;  %v485_v29 = vunpack.i.l.bf16 %v484_v25  ;;  %v521_v52 = vunpack.i.h.bf16 %v519_v26  ;;  %v520_v53 = vunpack.i.l.bf16 %v519_v26 }
 0x114   :  { %v267_v32 = vsel %vm80_vm7, %v485_v29, %v486_v28  ;;  %v266_v34 = vsel %vm80_vm7, %v496_v27, %v485_v29  ;;  %v307_v3 = vsel %vm123_vm10, %v520_v53, %v521_v52  ;;  %v327_v28 = vpack.c.bf16 %v311_v35, %v311_v35 }
 0x115   :  { %v499_v36 = vpop.permute.xlu1 %498  ;;  %v524_v37 = vpop.permute.xlu0 %523  ;;  %v316_v38 = vsel %vm131_vm8, %v257_v31, %v267_v32  ;;  %v315_v39 = vsel %vm131_vm8, %v256_v33, %v266_v34  ;;  %v326_v29 = vpack.c.bf16 %v231_v7, %v231_v7  ;;  %v321_v31 = vld [vmem:[%s742_s1] sm:$0xf] }
 0x116   :  { %v501_v40 = vunpack.i.h.bf16 %v499_v36  ;;  %v500_v43 = vunpack.i.l.bf16 %v499_v36  ;;  %v323_v49 = vpack.c.bf16 %v316_v38, %v314_v44  ;;  %v322_v50 = vpack.c.bf16 %v315_v39, %v313_v45 }
 0x117   :  { %v525_v55 = vunpack.i.l.bf16 %v524_v37  ;;  %v526_v62 = vunpack.i.h.bf16 %v524_v37  ;;  %v338_v30 = vsel %vm157_vm12, %v326_v29, 0 }
 0x118   :  { %343 = vmatprep.subr.bf16.mxu1 %v323_v49  ;;  %v277_v60 = vsel %vm32_vm3, %v500_v43, %v501_v40  ;;  %v276_v8 = vsel %vm32_vm3, %v471_v16, %v500_v43 }
 0x119   :  { %v509_v57 = vpop.permute.xlu1 %508  ;;  %v529_v59 = vpop.permute.xlu0 %528  ;;  %344 = vmatpush1.bf16.msra.mxu1 %v322_v50  ;;  %v102_v9 = vsel %vm101_vm11, %v525_v55, %v440_v61  ;;  %v318_v13 = vsel %vm131_vm8, %v277_v60, %v287_v2  ;;  %v286_v14 = vsel %vm101_vm11, %v526_v62, %v505_v48  ;;  %v397_v2 = vld [vmem:[%s744_s4] sm:$0xff] }
 0x11a   :  { %v511_v63 = vunpack.i.h.bf16 %v509_v57  ;;  %v510_v17 = vunpack.i.l.bf16 %v509_v57  ;;  %v531_v5 = vunpack.i.h.bf16 %v529_v59  ;;  %v530_v6 = vunpack.i.l.bf16 %v529_v59 }
 0x11b   :  { %v136_v41 = vsel %vm131_vm8, %v91_v20, %v102_v9  ;;  %v317_v25 = vsel %vm131_vm8, %v276_v8, %v286_v14 }
 0x11c   :  { %v297_v4 = vsel %vm112_vm9, %v510_v17, %v511_v63  ;;  %v124_v61 = vsel %vm123_vm10, %v530_v6, %v445_v56  ;;  %v306_v22 = vsel %vm123_vm10, %v531_v5, %v520_v53  ;;  %v146_v56 = vpack.c.bf16 %v129_v21, %v129_v21 }
 0x11d   :  { %v514_v12 = vpop.permute.xlu1 %513  ;;  %v320_v58 = vsel %vm131_vm8, %v297_v4, %v307_v3 }
 0x11e   :  { %v516_v15 = vunpack.i.h.bf16 %v514_v12  ;;  %v515_v18 = vunpack.i.l.bf16 %v514_v12  ;;  %v325_v19 = vpack.c.bf16 %v320_v58, %v318_v13 }
 0x120   :  { %v113_v23 = vsel %vm112_vm9, %v515_v18, %v460_v51  ;;  %v296_v24 = vsel %vm112_vm9, %v516_v15, %v510_v17  ;;  %345 = vmatprep.subr.bf16.mxu1 %v325_v19  ;;  %v159_v51 = vsel %vm157_vm12, %v145_v46, 0 }
 0x121   :  { %v138_v54 = vsel %vm131_vm8, %v113_v23, %v124_v61  ;;  %v319_v26 = vsel %vm131_vm8, %v296_v24, %v306_v22 }
 0x122   :  { %v143_v42 = vpack.c.bf16 %v138_v54, %v136_v41  ;;  %v324_v27 = vpack.c.bf16 %v319_v26, %v317_v25 }
 0x124   :  { %167 = vmatpush1.bf16.msra.mxu0 %v143_v42  ;;  %346 = vmatpush1.bf16.msra.mxu1 %v324_v27 }
 0x125   :  { %411 = vmatprep.subr.msk.bf16.mxu0 %vm157_vm12, %v146_v56  ;;  %414 = vmatprep.subr.msk.bf16.mxu1 %vm157_vm12, %v327_v28 }
 0x128   :  { %169 = vmatpush1.bf16.msra.mxu0 %v159_v51  ;;  %348 = vmatpush1.bf16.msra.mxu1 %v338_v30 }
 0x12a   :  { %v332_v32 = vpop.permute.xlu0 %331 }
 0x12b   :  { %412 = vmatmul.mubr.msk.bf16.vlgmr.msra.gmra.mrb[0].mxu0 %vm153_vm13, %v140_v10  ;;  %415 = vmatmul.mubr.msk.bf16.vlgmr.msra.gmra.mrb[0].mxu1 %vm153_vm13, %v321_v31 }
 0x12e   :  { %v151_v11 = vpop.permute.xlu1 %150 }
 0x1fe   :  { %v198_v33 = vpop.f32.mrb[0].mxu0  ;;  %v377_v34 = vpop.f32.mrb[0].mxu1 }
 0x1ff   :  { %v199_v36 = vadd.f32 %v198_v33, %v151_v11  ;;  %v200_v37 = vpop.f32.mrb[1].mxu0  ;;  %v379_v38 = vpop.f32.mrb[1].mxu1  ;;  %v378_v39 = vadd.f32 %v377_v34, %v332_v32 }
 0x200   :  { %v201_v40 = vadd.f32 %v200_v37, %v151_v11  ;;  %v202_v43 = vpop.f32.mrb[2].mxu0  ;;  %v381_v44 = vpop.f32.mrb[2].mxu1  ;;  %v380_v45 = vadd.f32 %v379_v38, %v332_v32 }
 0x201   :  { %205 = vst [vmem:[%s743_s3] sm:$0xff] %v199_v36  ;;  %v203_v47 = vpop.f32.mrb[3].mxu0  ;;  %416 = vst [vmem:[%s743_s3 + $0x10] sm:$0xff] %v378_v39  ;;  %v382_v48 = vpop.f32.mrb[3].mxu1  ;;  %v211_v49 = vmul.f32 %v199_v36, %v199_v36  ;;  %v391_v50 = vmul.f32 %v378_v39, %v378_v39 }
 0x202   :  { %206 = vst [vmem:[%s743_s3 + $0x8] sm:$0xff] %v201_v40  ;;  %417 = vst [vmem:[%s743_s3 + $0x18] sm:$0xff] %v380_v45  ;;  %v207_v52 = vadd.f32 %v201_v40, %v199_v36  ;;  %v212_v53 = vmul.f32 %v201_v40, %v201_v40  ;;  %v387_v55 = vadd.f32 %v380_v45, %v378_v39 }
 0x203   :  { %v392_v57 = vmul.f32 %v380_v45, %v380_v45 }
 0x204   :  { %208 = vadd.xlane.f32.xlu1 %v207_v52  ;;  %v213_v59 = vadd.f32 %v212_v53, %v211_v49 }
 0x205   :  { %v393_v60 = vadd.f32 %v392_v57, %v391_v50 }
 0x206   :  { %214 = vadd.xlane.f32.xlu0 %v213_v59 }
 0x208   :  { %388 = vadd.xlane.f32.xlu1 %v387_v55 }
 0x20a   :  { %394 = vadd.xlane.f32.xlu0 %v393_v60 }
 0x291   :  { %v209_v62 = vpop.xlane.xlu1 %208 }
 0x293   :  { %v215_v63 = vpop.xlane.xlu0 %214 }
 0x295   :  { %v389_v17 = vpop.xlane.xlu1 %388 }
 0x296   :  { %v390_v0 = vadd.f32 %v389_v17, %v209_v62 }
 0x297   :  { %v395_v16 = vpop.xlane.xlu0 %394 }
 0x298   :  { %v396_v3 = vadd.f32 %v395_v16, %v215_v63 }
 0x29a   :  { %v399_v4 = vsel %vm398_vm15, %v390_v0, %v396_v3 }
 0x29b   :  { %v400_v5 = vadd.f32 %v399_v4, %v397_v2 }
 0x29d   :  { %402 = vst.msk [vmem:[%s744_s4] sm:$0xff] %vm21_vm14, %v400_v5 }

</bundles_post_ra>
